<compile_context>
chip_gen: v7x
topology: tpu7x:2x2x1
jax: 0.10.0
libtpu: 0.0.40
codegen_flags: <defaults>
</compile_context>

<pallas_src>
import functools
import math

import jax
import jax.numpy as jnp
import numpy as np
from jax.experimental import pallas as pl
from jax.experimental.pallas import tpu as pltpu


# ----------------------------- hardware-aware knobs -----------------------------

def _tpu_vmem_capacity():
    try:
        info = pltpu.get_tpu_info()
        cap = getattr(info, "vmem_capacity_bytes", 0)
        if cap:
            return int(cap)
    except Exception:  # conservative fallback (older jax / detection failure)
        pass
    return 0


_VMEM_CAP = _tpu_vmem_capacity()
_BIG_VMEM = _VMEM_CAP >= (100 << 20)          # v5e/v6e: 128 MiB; v7x: 64 MiB; unknown: small
_VMEM_LIMIT = (96 << 20) if _BIG_VMEM else (32 << 20)


# ----------------------------- small helpers -----------------------------

def _round_up(x, m):
    return ((x + m - 1) // m) * m


def _pad_to(x, shape):
    pads = [(0, s - d) for d, s in zip(x.shape, shape)]
    if all(p == (0, 0) for p in pads):
        return x
    return jnp.pad(x, pads)


def _choose_chunk(n, target, align):
    """Largest chunk <= target that divides n and is a multiple of `align`.
    Falls back to the full extent (always layout-legal as a full-dim block)."""
    if n <= target:
        return n
    for c in range(target, 0, -1):
        if n % c == 0 and c % align == 0:
            return c
    return n


def _parallel_chunk(nb, d, target):
    """Channel chunk: lane-dense, but small enough that the 'parallel' grid axes
    expose >= 2 blocks (v7x has 2 TensorCores sharded via dimension_semantics)."""
    td = _choose_chunk(d, target, 128)
    while nb * (d // td) < 2 and td % 256 == 0 and d % (td // 2) == 0:
        td //= 2
    return td


def _sigmoid(x):
    return 1.0 / (1.0 + jnp.exp(-x))


def _silu(x):
    return x * _sigmoid(x)


def _softplus(x):
    # matches torch.nn.functional.softplus (threshold=20)
    # TODO(synk): log1p would be marginally more precise for very negative x.
    return jnp.where(x > 20.0, x, jnp.log(1.0 + jnp.exp(jnp.minimum(x, 20.0))))


# ------------------------------- linear (tiled matmul) -------------------------------

def _linear_kernel(x_ref, w_ref, b_ref, o_ref, acc_ref, *, activation, k_steps):
    k = pl.program_id(2)

    @pl.when(k == 0)
    def _():
        acc_ref[...] = jnp.zeros_like(acc_ref)

    # bf16 operands straight from HBM onto the MXU, f32 accumulation.
    acc_ref[...] += jnp.dot(x_ref[...], w_ref[...],
                            preferred_element_type=jnp.float32)

    @pl.when(k == k_steps - 1)
    def _():
        y = acc_ref[...] + b_ref[...]
        if activation == "silu":
            y = _silu(y)
        o_ref[...] = y.astype(o_ref.dtype)


def linear_op(x, w, b=None, activation="none", out_dtype=jnp.bfloat16, use_pallas=True):
    """x: [M, K], w: [K, N] (bf16 weights), b: [N]|None -> [M, N] out_dtype.
    bf16 MXU operands, f32 accumulation."""
    M, K = x.shape
    N = w.shape[1]
    x_bf = x.astype(jnp.bfloat16)
    w_bf = w.astype(jnp.bfloat16)                       # no-op when params are already bf16
    bvec = jnp.zeros((N,), jnp.float32) if b is None else b.astype(jnp.float32)
    if not use_pallas:
        y = jnp.dot(x_bf, w_bf, preferred_element_type=jnp.float32) + bvec[None, :]
        if activation == "silu":
            y = _silu(y)
        return y.astype(out_dtype)

    tm = min(_round_up(M, 8), 512 if _BIG_VMEM else 256)
    tn = min(_round_up(N, 128), 512 if _BIG_VMEM else 256)
    tk = min(_round_up(K, 128), 512)
    Mp, Kp, Np = _round_up(M, tm), _round_up(K, tk), _round_up(N, tn)
    xp = _pad_to(x_bf, (Mp, Kp))
    wp = _pad_to(w_bf, (Kp, Np))
    bp = _pad_to(bvec.reshape(1, N), (1, Np))
    k_steps = Kp // tk

    out = pl.pallas_call(
        functools.partial(_linear_kernel, activation=activation, k_steps=k_steps),
        out_shape=jax.ShapeDtypeStruct((Mp, Np), out_dtype),
        grid=(Mp // tm, Np // tn, k_steps),
        in_specs=[
            pl.BlockSpec((tm, tk), lambda i, j, k: (i, k)),
            pl.BlockSpec((tk, tn), lambda i, j, k: (k, j)),
            pl.BlockSpec((1, tn), lambda i, j, k: (0, j)),
        ],
        out_specs=pl.BlockSpec((tm, tn), lambda i, j, k: (i, j)),
        scratch_shapes=[pltpu.VMEM((tm, tn), jnp.float32)],
        compiler_params=pltpu.CompilerParams(
            dimension_semantics=("parallel", "parallel", "arbitrary"),
            vmem_limit_bytes=_VMEM_LIMIT),
    )(xp, wp, bp)
    return out[:M, :N]


# ------------------------------- layernorm (row tiled) -------------------------------

def _layernorm_kernel(x_ref, g_ref, b_ref, o_ref):
    x = x_ref[...].astype(jnp.float32)
    mu = jnp.mean(x, axis=-1, keepdims=True)
    var = jnp.mean((x - mu) ** 2, axis=-1, keepdims=True)
    xn = (x - mu) * jax.lax.rsqrt(var + 1e-5)
    o_ref[...] = (xn * g_ref[...] + b_ref[...]).astype(o_ref.dtype)


def layernorm_op(x, gamma, beta, out_dtype=jnp.bfloat16, use_pallas=True):
    """x: [M, D] -> [M, D] out_dtype; eps=1e-5, biased variance, f32 statistics."""
    M, D = x.shape
    g2 = gamma.reshape(1, D).astype(jnp.float32)
    b2 = beta.reshape(1, D).astype(jnp.float32)
    if not use_pallas:
        xf = x.astype(jnp.float32)
        mu = jnp.mean(xf, axis=-1, keepdims=True)
        var = jnp.mean((xf - mu) ** 2, axis=-1, keepdims=True)
        return ((xf - mu) * jax.lax.rsqrt(var + 1e-5) * g2 + b2).astype(out_dtype)

    # Cap the row tile so (in + out blocks, double buffered) stay within ~half the limit.
    bytes_per_row = D * (x.dtype.itemsize * 2 + jnp.dtype(out_dtype).itemsize * 2)
    cap = max(8, ((_VMEM_LIMIT // 2) // max(bytes_per_row, 1)) // 8 * 8)
    tm = min(_round_up(M, 8), 1024 if _BIG_VMEM else 256, cap)
    Mp = _round_up(M, tm)
    xp = _pad_to(x, (Mp, D))
    out = pl.pallas_call(
        _layernorm_kernel,
        out_shape=jax.ShapeDtypeStruct((Mp, D), out_dtype),
        grid=(Mp // tm,),
        in_specs=[
            pl.BlockSpec((tm, D), lambda i: (i, 0)),
            pl.BlockSpec((1, D), lambda i: (0, 0)),
            pl.BlockSpec((1, D), lambda i: (0, 0)),
        ],
        out_specs=pl.BlockSpec((tm, D), lambda i: (i, 0)),
        compiler_params=pltpu.CompilerParams(
            dimension_semantics=("parallel",),
            vmem_limit_bytes=_VMEM_LIMIT),
    )(xp, g2, b2)
    return out[:M]


# --------------------- causal depthwise conv1d + SiLU (B, D tiled) ---------------------

def _dwconv_silu_kernel(xpad_ref, w_ref, o_ref, *, K, L):
    # TODO(synk): generate the shifted taps with pltpu.roll (XLU) / aligned halo tiles
    # instead of K-1 sublane-unaligned static slices when L becomes long.
    w = w_ref[...].astype(jnp.float32)                                   # [K, 1, td]
    acc = xpad_ref[K - 1:K - 1 + L, :].astype(jnp.float32) * w[K - 1]
    for k in range(K - 1):
        acc = acc + xpad_ref[k:k + L, :].astype(jnp.float32) * w[k]
    o_ref[...] = _silu(acc).astype(o_ref.dtype)


def dwconv_silu_op(x, w, use_pallas=True):
    """Causal depthwise conv1d (groups=D, left pad K-1) fused with SiLU.
    x: [B, L, D] (bf16) channels-last, w: [K, 1, D] -> [B, L, D] bf16."""
    B, L, D = x.shape
    K = w.shape[0]
    xpad = jnp.pad(x.astype(jnp.bfloat16), ((0, 0), (K - 1, 0), (0, 0)))
    if not use_pallas:
        acc = jnp.zeros((B, L, D), jnp.float32)
        for k in range(K):
            acc = acc + xpad[:, k:k + L, :].astype(jnp.float32) * w[k].astype(jnp.float32)
        return _silu(acc).astype(jnp.bfloat16)

    td = _parallel_chunk(B, D, 512 if _BIG_VMEM else 256)
    # TODO(synk): L is kept whole per block (halo-free); tile L with a (K-1) halo on v7x
    # if sequences get long enough to pressure the 64 MiB VMEM.
    return pl.pallas_call(
        functools.partial(_dwconv_silu_kernel, K=K, L=L),
        out_shape=jax.ShapeDtypeStruct((B, L, D), jnp.bfloat16),
        grid=(B, D // td),
        in_specs=[
            pl.BlockSpec((None, L + K - 1, td), lambda b, d: (b, 0, d)),
            pl.BlockSpec((K, 1, td), lambda b, d: (0, 0, d)),
        ],
        out_specs=pl.BlockSpec((None, L, td), lambda b, d: (b, 0, d)),
        compiler_params=pltpu.CompilerParams(
            dimension_semantics=("parallel", "parallel"),
            vmem_limit_bytes=_VMEM_LIMIT),
    )(xpad, w.astype(jnp.float32))


# --------------------------- selective scan (S6 recurrence) ---------------------------

def _ssm_scan_kernel(u_ref, dtun_ref, bp_ref, cp_ref, z_ref, a_ref, dskip_ref,
                     dtw_ref, dtb_ref, o_ref, h_ref, dA_ref, dBu_ref, *, TL):
    # Reset the carried state at the first L-chunk of every (batch, D-tile).
    @pl.when(pl.program_id(2) == 0)
    def _():
        h_ref[...] = jnp.zeros_like(h_ref)

    A = a_ref[...]                              # [N, TD]  (channels on the lane axis)
    A_recip = 1.0 / (A + 1e-10)                 # loop-invariant (A <= -1 by construction)
    u = u_ref[...].astype(jnp.float32)          # [TL, TD]
    bp = bp_ref[...].astype(jnp.float32)        # [TL, N]

    # Fused dt_proj + softplus (removes a whole [B, L, D] HBM round-trip per layer).
    dt = jnp.dot(dtun_ref[...], dtw_ref[...], preferred_element_type=jnp.float32)
    dt = _softplus(dt + dtb_ref[...])           # [TL, TD]

    # Fully parallel ZOH discretization for the whole chunk (off the serial path).
    # TODO(synk): bf16 dA/dBu scratch on v6e/v7x and the cumsum (chunk-parallel)
    # reformulation are further levers; kept f32 + serial FMA here for exactness.
    dA = jnp.exp(dt[:, None, :] * A[None, :, :])                              # [TL, N, TD]
    dA_ref[...] = dA
    dBu_ref[...] = ((dA - 1.0) * A_recip[None, :, :]) * bp[:, :, None] * u[:, None, :]

    # Minimal serial recurrence: ONE vector FMA per step.  The h history overwrites the
    # dA slot it just consumed, so the C projection / output are fully off the chain.
    def body(t, h):
        h = dA_ref[t] * h + dBu_ref[t]                                        # [N, TD]
        dA_ref[t] = h
        return h

    h_ref[...] = jax.lax.fori_loop(0, TL, body, h_ref[...])

    # Vectorized epilogue for the whole chunk: y_t = sum_n cp[t,n] * h_t[n,:]
    # (VPU mul + sublane reduce), then D-skip + SiLU(z) gate, one lane-dense store.
    cp = cp_ref[...].astype(jnp.float32)                                      # [TL, N]
    y = jnp.sum(cp[:, :, None] * dA_ref[...], axis=1)                         # [TL, TD]
    z = z_ref[...].astype(jnp.float32)
    o_ref[...] = ((y + u * dskip_ref[...]) * _silu(z)).astype(o_ref.dtype)


def ssm_scan_op(u, dt_un, bp, cp, z, A, Dskip, dt_w, dt_b, use_pallas=True):
    """Sequential selective scan, batch-major (no transposes), dt_proj fused in-kernel.

    u/z: [B, L, D] bf16; dt_un: [B, L, R] bf16; bp/cp: [B, L, N] bf16;
    A: [D, N] f32 (negative); dt_w: [R, D]; dt_b: [D]. Returns [B, L, D] bf16.
    """
    B, L, D = u.shape
    N = A.shape[1]
    R = dt_w.shape[0]
    A_t = jnp.transpose(A).astype(jnp.float32)          # [N, D] — channels on lanes
    Dv = Dskip.reshape(1, D).astype(jnp.float32)
    dt_b2 = dt_b.reshape(1, D).astype(jnp.float32)
    Rp = _round_up(R, 128)                               # pad tiny dt_rank once, in bf16
    dtun_p = _pad_to(dt_un.astype(jnp.bfloat16), (B, L, Rp))
    dtw_p = _pad_to(dt_w.astype(jnp.bfloat16), (Rp, D))

    if not use_pallas:
        dt = _softplus(jnp.einsum("blr,rd->bld", dtun_p, dtw_p,
                                  preferred_element_type=jnp.float32) + dt_b2)
        A_recip = 1.0 / (A_t + 1e-10)
        u_f, z_f = u.astype(jnp.float32), z.astype(jnp.float32)
        bp_f, cp_f = bp.astype(jnp.float32), cp.astype(jnp.float32)

        def body(h, inp):
            u_t, dt_t, bp_t, cp_t, z_t = inp
            dA = jnp.exp(dt_t[:, None, :] * A_t[None, :, :])                  # [B, N, D]
            dBu = (dA - 1.0) * A_recip[None] * bp_t[:, :, None] * u_t[:, None, :]
            h = dA * h + dBu
            y_t = jnp.sum(cp_t[:, :, None] * h, axis=1)                       # [B, D]
            y_t = (y_t + u_t * Dv) * _silu(z_t)
            return h, y_t

        h0 = jnp.zeros((B, N, D), jnp.float32)
        xs = tuple(jnp.moveaxis(a, 1, 0) for a in (u_f, dt, bp_f, cp_f, z_f))
        _, ys = jax.lax.scan(body, h0, xs)
        return jnp.moveaxis(ys, 0, 1).astype(jnp.bfloat16)

    tl = _choose_chunk(L, 128 if _BIG_VMEM else 64, 8)
    td = _parallel_chunk(B, D, 512 if _BIG_VMEM else 256)
    cost = pl.CostEstimate(
        flops=10 * B * L * N * D + 2 * B * L * Rp * D,
        transcendentals=B * L * N * D,
        bytes_accessed=2 * (4 * B * L * D + 2 * B * L * N + B * L * Rp) + 4 * N * D)
    return pl.pallas_call(
        functools.partial(_ssm_scan_kernel, TL=tl),
        out_shape=jax.ShapeDtypeStruct((B, L, D), jnp.bfloat16),
        grid=(B, D // td, L // tl),
        in_specs=[
            pl.BlockSpec((None, tl, td), lambda b, d, c: (b, c, d)),   # u
            pl.BlockSpec((None, tl, Rp), lambda b, d, c: (b, c, 0)),   # dt_un (lane-padded)
            pl.BlockSpec((None, tl, N), lambda b, d, c: (b, c, 0)),    # B_proj
            pl.BlockSpec((None, tl, N), lambda b, d, c: (b, c, 0)),    # C_proj
            pl.BlockSpec((None, tl, td), lambda b, d, c: (b, c, d)),   # z (gate)
            pl.BlockSpec((N, td), lambda b, d, c: (0, d)),             # A^T
            pl.BlockSpec((1, td), lambda b, d, c: (0, d)),             # D skip
            pl.BlockSpec((Rp, td), lambda b, d, c: (0, d)),            # dt_proj weight
            pl.BlockSpec((1, td), lambda b, d, c: (0, d)),             # dt_proj bias
        ],
        out_specs=pl.BlockSpec((None, tl, td), lambda b, d, c: (b, c, d)),
        scratch_shapes=[
            pltpu.VMEM((N, td), jnp.float32),       # carried SSM state h
            pltpu.VMEM((tl, N, td), jnp.float32),   # dA, then reused as h history
            pltpu.VMEM((tl, N, td), jnp.float32),   # discretized B*u per chunk
        ],
        compiler_params=pltpu.CompilerParams(
            dimension_semantics=("parallel", "parallel", "arbitrary"),
            vmem_limit_bytes=_VMEM_LIMIT),
        cost_estimate=cost,
    )(u.astype(jnp.bfloat16), dtun_p, bp.astype(jnp.bfloat16), cp.astype(jnp.bfloat16),
      z.astype(jnp.bfloat16), A_t, Dv, dtw_p, dt_b2)


# ------------------------------ model (glue + kernels) ------------------------------

def sinusoidal_embedding(t, dim):
    half = dim // 2
    scale = math.log(10000.0) / (half - 1)
    freqs = jnp.exp(jnp.arange(half, dtype=jnp.float32) * -scale)
    args = t.astype(jnp.float32)[:, None] * freqs[None, :]
    emb = jnp.concatenate([jnp.sin(args), jnp.cos(args)], axis=-1)
    if dim % 2 == 1:
        emb = jnp.pad(emb, ((0, 0), (0, 1)))
    return emb


def selective_scan_forward(x, p, use_pallas=True):
    """SelectiveScan.forward: x [B, L, D] -> [B, L, D] (f32, residual-friendly)."""
    B, L, D = x.shape
    N = p["A"].shape[1]
    dt_rank = p["dt_w"].shape[0]
    proj = linear_op(x.reshape(B * L, D), p["in_proj_w"], None,
                     out_dtype=jnp.bfloat16, use_pallas=use_pallas).reshape(B, L, -1)
    x_conv_in = proj[..., :D]
    z = proj[..., D:2 * D]
    dt_un = proj[..., 2 * D:2 * D + dt_rank]
    Bp = proj[..., 2 * D + dt_rank:2 * D + dt_rank + N]
    Cp = proj[..., 2 * D + dt_rank + N:]

    u = dwconv_silu_op(x_conv_in, p["conv_w"], use_pallas=use_pallas)     # bf16
    y = ssm_scan_op(u, dt_un, Bp, Cp, z, p["A"], p["Dskip"], p["dt_w"], p["dt_b"],
                    use_pallas=use_pallas)
    return linear_op(y.reshape(B * L, D), p["out_proj_w"], None,
                     out_dtype=jnp.float32, use_pallas=use_pallas).reshape(B, L, D)


def hydra_block_forward(h, p, use_pallas=True):
    B, L, D = h.shape
    hn1 = layernorm_op(h.reshape(B * L, D), p["norm1_g"], p["norm1_b"],
                       use_pallas=use_pallas).reshape(B, L, D)
    h = h + selective_scan_forward(hn1, p, use_pallas)
    hn2 = layernorm_op(h.reshape(B * L, D), p["norm2_g"], p["norm2_b"],
                       use_pallas=use_pallas).reshape(B, L, D)
    m = linear_op(hn2.reshape(B * L, D), p["mlp_w1"], p["mlp_b1"],
                  out_dtype=jnp.bfloat16, use_pallas=use_pallas)
    # TODO(synk): exact erf-GELU (nn.GELU default) kept as elementwise JAX glue.
    m = jax.nn.gelu(m, approximate=False)
    m = linear_op(m, p["mlp_w2"], p["mlp_b2"], out_dtype=jnp.float32,
                  use_pallas=use_pallas).reshape(B, L, D)
    return h + m


def hydra_forward(params, x_ids, t, use_pallas=True):
    B, L = x_ids.shape
    D = params["tok_emb"].shape[1]
    # TODO(synk): token-embedding gather stays in plain JAX (no clean Pallas gather here).
    tok = jnp.take(params["tok_emb"], x_ids, axis=0)                 # [B, L, D] f32
    te = sinusoidal_embedding(t, D)                                  # [B, D]
    te = linear_op(te, params["time_w1"], params["time_b1"], activation="silu",
                   out_dtype=jnp.bfloat16, use_pallas=use_pallas)
    te = linear_op(te, params["time_w2"], params["time_b2"], out_dtype=jnp.float32,
                   use_pallas=use_pallas)
    h = tok + te[:, None, :]                                         # f32 residual stream
    for lp in params["layers"]:
        h = hydra_block_forward(h, lp, use_pallas)
    hn = layernorm_op(h.reshape(B * L, D), params["norm_out_g"], params["norm_out_b"],
                      use_pallas=use_pallas).reshape(B, L, D)
    V = params["lm_w"].shape[1]
    logits = linear_op(hn.reshape(B * L, D), params["lm_w"], params["lm_b"],
                       out_dtype=jnp.float32, use_pallas=use_pallas)
    return logits.reshape(B, L, V)


# ------------------------------ deterministic init ------------------------------

def init_params(key, vocab, D, depth, N, K, dt_rank, mlp_mult):
    def nrm(k, shape, scale=0.02, dtype=jnp.float32):
        return (scale * jax.random.normal(k, shape, dtype=jnp.float32)).astype(dtype)

    keys = jax.random.split(key, 1 + depth)
    kt = jax.random.split(keys[0], 6)
    params = {
        "tok_emb": nrm(kt[0], (vocab + 1, D)),
        # matmul weights stored bf16 once (kernels never re-cast / re-write them per call)
        "time_w1": nrm(kt[1], (D, D * 4), dtype=jnp.bfloat16),
        "time_b1": jnp.zeros((D * 4,), jnp.float32),
        "time_w2": nrm(kt[2], (D * 4, D), dtype=jnp.bfloat16),
        "time_b2": jnp.zeros((D,), jnp.float32),
        "norm_out_g": jnp.ones((D,), jnp.float32),
        "norm_out_b": jnp.zeros((D,), jnp.float32),
        "lm_w": nrm(kt[3], (D, vocab), dtype=jnp.bfloat16),
        "lm_b": jnp.zeros((vocab,), jnp.float32),
        "layers": [],
    }
    mlp_dim = D * mlp_mult
    for li in range(depth):
        kl = jax.random.split(keys[1 + li], 6)
        lp = {
            "norm1_g": jnp.ones((D,), jnp.float32),
            "norm1_b": jnp.zeros((D,), jnp.float32),
            "in_proj_w": nrm(kl[0], (D, 2 * D + dt_rank + 2 * N), dtype=jnp.bfloat16),
            "conv_w": nrm(kl[1], (K, 1, D), scale=0.1),
            "dt_w": nrm(kl[2], (dt_rank, D), scale=0.1),
            "dt_b": jnp.zeros((D,), jnp.float32),                # dt_proj.bias init 0
            # A = -exp(A_log) = -[1..N] replicated per channel (fixed, non-trainable)
            "A": -jnp.tile(jnp.arange(1, N + 1, dtype=jnp.float32)[None, :], (D, 1)),
            "Dskip": jnp.ones((D,), jnp.float32),                # self.D = ones(D)
            "out_proj_w": nrm(kl[3], (D, D), dtype=jnp.bfloat16),
            "norm2_g": jnp.ones((D,), jnp.float32),
            "norm2_b": jnp.zeros((D,), jnp.float32),
            "mlp_w1": nrm(kl[4], (D, mlp_dim), dtype=jnp.bfloat16),
            "mlp_b1": jnp.zeros((mlp_dim,), jnp.float32),
            "mlp_w2": nrm(kl[5], (mlp_dim, D), dtype=jnp.bfloat16),
            "mlp_b2": jnp.zeros((D,), jnp.float32),
        }
        params["layers"].append(lp)
    return params


# ------------------------------------ main ------------------------------------

if __name__ == "__main__":
    VOCAB, D, DEPTH, N, K, MLP_MULT, T = 64, 32, 2, 16, 4, 4, 10
    DT_RANK = math.ceil(D / 16)   # 'auto' -> 2
    B, L = 2, 8

    root = jax.random.PRNGKey(0)
    k_params, k_x, k_t = jax.random.split(root, 3)
    params = init_params(k_params, VOCAB, D, DEPTH, N, K, DT_RANK, MLP_MULT)
    x_ids = jax.random.randint(k_x, (B, L), 0, VOCAB, dtype=jnp.int32)  # noisy x_t tokens
    t = jax.random.randint(k_t, (B,), 0, T, dtype=jnp.int32)            # diffusion timesteps

    logits = hydra_forward(params, x_ids, t, use_pallas=True)
    logits = jax.block_until_ready(logits)
    assert logits.shape == (B, L, VOCAB)
    assert bool(jnp.all(jnp.isfinite(logits)))

    # cross-check Pallas kernels against a pure-JAX reference of the same math
    # (both use bf16 activations/weights at kernel boundaries with f32 accumulation)
    ref = jax.block_until_ready(hydra_forward(params, x_ids, t, use_pallas=False))
    err = float(np.max(np.abs(np.asarray(logits) - np.asarray(ref))))
    assert np.allclose(np.asarray(logits), np.asarray(ref), atol=2e-2, rtol=2e-2), err

    print("KERNEL_OK")
</pallas_src>

<mosaic_0001>
module attributes {stable_mosaic.version = 11 : i64} {
  func.func @_linear_kernel(%arg0: i32, %arg1: i32, %arg2: i32, %arg3: memref<8x128xbf16, #tpu.memory_space<vmem>>, %arg4: memref<128x128xbf16, #tpu.memory_space<vmem>>, %arg5: memref<1x128xf32, #tpu.memory_space<vmem>>, %arg6: memref<8x128xbf16, #tpu.memory_space<vmem>>, %arg7: memref<8x128xf32, #tpu.memory_space<vmem>>) attributes {dimension_semantics = [#tpu.dimension_semantics<parallel>, #tpu.dimension_semantics<parallel>, #tpu.dimension_semantics<arbitrary>], iteration_bounds = array<i64: 1, 1, 1>, scalar_prefetch = 0 : i64, scratch_operands = 1 : i64, tpu.core_type = #tpu.core_type<tc>, window_params = [{transform_indices = @transform_0, window_bounds = array<i64: 8, 128>}, {transform_indices = @transform_1, window_bounds = array<i64: 128, 128>}, {transform_indices = @transform_2, window_bounds = array<i64: 1, 128>}, {transform_indices = @transform_3, window_bounds = array<i64: 8, 128>}]} {
    %c0_i32 = arith.constant 0 : i32
    %0 = arith.cmpi eq, %arg2, %c0_i32 : i32
    %1 = arith.extui %0 : i1 to i32
    %c0_i32_0 = arith.constant 0 : i32
    %2 = arith.cmpi ne, %1, %c0_i32_0 : i32
    scf.if %2 {
      %cst_10 = arith.constant 0.000000e+00 : f32
      %12 = vector.broadcast %cst_10 : f32 to vector<8x128xf32>
      %c0_11 = arith.constant 0 : index
      %c0_12 = arith.constant 0 : index
      %13 = vector.load %arg7[%c0_11, %c0_12] : memref<8x128xf32, #tpu.memory_space<vmem>>, vector<8x128xf32>
      tpu.vector_store %arg7[%c0_11, %c0_12], %12 {strides = array<i32>} : memref<8x128xf32, #tpu.memory_space<vmem>>, vector<8x128xf32>,
    } else {
    }
    %c0 = arith.constant 0 : index
    %c0_1 = arith.constant 0 : index
    %3 = vector.load %arg7[%c0, %c0_1] : memref<8x128xf32, #tpu.memory_space<vmem>>, vector<8x128xf32>
    %c0_2 = arith.constant 0 : index
    %c0_3 = arith.constant 0 : index
    %4 = vector.load %arg3[%c0_2, %c0_3] : memref<8x128xbf16, #tpu.memory_space<vmem>>, vector<8x128xbf16>
    %c0_4 = arith.constant 0 : index
    %c0_5 = arith.constant 0 : index
    %5 = vector.load %arg4[%c0_4, %c0_5] : memref<128x128xbf16, #tpu.memory_space<vmem>>, vector<128x128xbf16>
    %cst = arith.constant dense<0.000000e+00> : vector<8x128xf32>
    %6 = tpu.matmul %4, %5, %cst {dimension_numbers = #tpu.dot_dimension_numbers<[1], [0], [0], [1], [0, 0, 1, 1], [], []>} : vector<8x128xbf16>, vector<128x128xbf16>, vector<8x128xf32> -> vector<8x128xf32>
    %7 = arith.addf %3, %6 : vector<8x128xf32>
    %c0_6 = arith.constant 0 : index
    %c0_7 = arith.constant 0 : index
    %8 = vector.load %arg7[%c0_6, %c0_7] : memref<8x128xf32, #tpu.memory_space<vmem>>, vector<8x128xf32>
    tpu.vector_store %arg7[%c0_6, %c0_7], %7 {strides = array<i32>} : memref<8x128xf32, #tpu.memory_space<vmem>>, vector<8x128xf32>,
    %c0_i32_8 = arith.constant 0 : i32
    %9 = arith.cmpi eq, %arg2, %c0_i32_8 : i32
    %10 = arith.extui %9 : i1 to i32
    %c0_i32_9 = arith.constant 0 : i32
    %11 = arith.cmpi ne, %10, %c0_i32_9 : i32
    scf.if %11 {
      %c0_10 = arith.constant 0 : index
      %c0_11 = arith.constant 0 : index
      %12 = vector.load %arg7[%c0_10, %c0_11] : memref<8x128xf32, #tpu.memory_space<vmem>>, vector<8x128xf32>
      %c0_12 = arith.constant 0 : index
      %c0_13 = arith.constant 0 : index
      %13 = vector.load %arg5[%c0_12, %c0_13] : memref<1x128xf32, #tpu.memory_space<vmem>>, vector<1x128xf32>
      %14 = vector.broadcast %13 : vector<1x128xf32> to vector<8x128xf32>
      %15 = arith.addf %12, %14 : vector<8x128xf32>
      %cst_14 = arith.constant 0.000000e+00 : f32
      %16 = vector.broadcast %cst_14 : f32 to vector<8x128xf32>
      %17 = arith.subf %16, %15 : vector<8x128xf32>
      %18 = math.exp %17 : vector<8x128xf32>
      %cst_15 = arith.constant 1.000000e+00 : f32
      %19 = vector.broadcast %cst_15 : f32 to vector<8x128xf32>
      %20 = arith.addf %19, %18 : vector<8x128xf32>
      %cst_16 = arith.constant 1.000000e+00 : f32
      %21 = vector.broadcast %cst_16 : f32 to vector<8x128xf32>
      %22 = arith.divf %21, %20 : vector<8x128xf32>
      %23 = arith.mulf %15, %22 : vector<8x128xf32>
      %24 = arith.truncf %23 : vector<8x128xf32> to vector<8x128xbf16>
      %c0_17 = arith.constant 0 : index
      %c0_18 = arith.constant 0 : index
      %25 = vector.load %arg6[%c0_17, %c0_18] : memref<8x128xbf16, #tpu.memory_space<vmem>>, vector<8x128xbf16>
      tpu.vector_store %arg6[%c0_17, %c0_18], %24 {strides = array<i32>} : memref<8x128xbf16, #tpu.memory_space<vmem>>, vector<8x128xbf16>,
    } else {
    }
    return
  }
  func.func @transform_0(%arg0: i32, %arg1: i32, %arg2: i32) -> (i32, i32) {
    %c0_i32 = arith.constant 0 : i32
    return %arg0, %arg2 : i32, i32
  }
  func.func @transform_1(%arg0: i32, %arg1: i32, %arg2: i32) -> (i32, i32) {
    %c0_i32 = arith.constant 0 : i32
    return %arg2, %arg1 : i32, i32
  }
  func.func @transform_2(%arg0: i32, %arg1: i32, %arg2: i32) -> (i32, i32) {
    %c0_i32 = arith.constant 0 : i32
    %c0_i32_0 = arith.constant 0 : i32
    return %c0_i32, %arg1 : i32, i32
  }
  func.func @transform_3(%arg0: i32, %arg1: i32, %arg2: i32) -> (i32, i32) {
    %c0_i32 = arith.constant 0 : i32
    return %arg0, %arg1 : i32, i32
  }
}

</mosaic_0001>

<bundles_post_ra>
// kernel: tpu_custom_call.1
= control target key start
LH: loop header
LB: loop body
LE: loop exit
PB: predicated region body
PF: predicated region fallthrough
CT: control target
= control target key end

     0   :  { %8 = vsyncpa [#allocation4], 0  ;;  %s394_s0 = inlined_call_operand.hbm [shape: bf16[8,128], index: 0, kind: input, shape index: {}]   ;;  %s395_s1 = inlined_call_operand.hbm [shape: bf16[128,128], index: 1, kind: input, shape index: {}]   ;;  %s396_s2 = inlined_call_operand.vmem [shape: f32[1,128], index: 2, kind: input, shape index: {}]   ;;  %s397_s3 = inlined_call_operand.hbm [shape: bf16[8,128], index: 3, kind: output, shape index: {}]  }
   0x1   :  { %9 = vsyncpa [#allocation7], 0 }
   0x2   :  { %10 = vsyncpa [#allocation5], 0  ;;  %s321_s12 = smov [#allocation3]   ;;  %s322_s14 = smov [#allocation6]  }
   0x3   :  { %s17_s13 = sshll.u32 %s321_s12, 4  ;;  %s26_s15 = sshll.u32 %s322_s14, 4  ;;  %s18_s13 = int_to_ptr.vmem [resolvable:$true] %s17_s13  ;;  %s348_s15 = int_to_ptr.vmem [resolvable:$true] %s26_s15 }
   0x4   :  { %s249_s18 = scalar_lea.hbm %s394_s0, 64 }
   0x5   :  { %p250_p0 = scmp.ne.s32.totalorder %s394_s0, %s249_s18  ;;  %p253_p1 = scmp.lt.u32.totalorder %s249_s18, %s394_s0 }
   0x7   :  { %p255_p2 = pnand %p253_p1, %p250_p0 }
   0x9   :  { %258 = shalt.err (!%p255_p2)
}
   0xa   :  { %s259_s23 = scalar_lea.vmem %s18_s13, 64  ;;  %p264_p4 = scmp.lt.s32.totalorder %s18_s13, %s18_s13 }
   0xb   :  { %p260_p3 = scmp.ne.s32.totalorder %s18_s13, %s259_s23  ;;  %p265_p5 = scmp.lt.s32.totalorder %s259_s23, %s259_s23 }
   0xd   :  { %p266_p6 = por %p265_p5, %p264_p4 }
   0xf   :  { %p267_p7 = pnand %p266_p6, %p260_p3 }
  0x11   :  { %270 = shalt.err (!%p267_p7)
}
  0x12   :  { %20 = dma.hbm_to_vmem [thread:$0]  %s394_s0, 64, %s18_s13, [#allocation4]  }
  0x13   :  { %s271_s28 = scalar_lea.hbm %s395_s1, 1024 }
  0x14   :  { %p272_p8 = scmp.ne.s32.totalorder %s395_s1, %s271_s28  ;;  %p275_p9 = scmp.lt.u32.totalorder %s271_s28, %s395_s1 }
  0x16   :  { %p277_p10 = pnand %p275_p9, %p272_p8 }
  0x18   :  { %280 = shalt.err (!%p277_p10)
}
  0x19   :  { %s281_s6 = scalar_lea.vmem %s348_s15, 1024  ;;  %p286_p12 = scmp.lt.s32.totalorder %s348_s15, %s348_s15 }
  0x1a   :  { %p282_p11 = scmp.ne.s32.totalorder %s348_s15, %s281_s6  ;;  %p287_p13 = scmp.lt.s32.totalorder %s281_s6, %s281_s6 }
  0x1c   :  { %p288_p0 = por %p287_p13, %p286_p12 }
  0x1e   :  { %p289_p1 = pnand %p288_p0, %p282_p11 }
  0x20   :  { %292 = shalt.err (!%p289_p1)
}
  0x21   :  { %s323_s0 = smov 64   ;;  %s324_s7 = smov 4  }
  0x22   :  { %32 = dma.hbm_to_vmem [thread:$0]  %s395_s1, 1024, %s348_s15, [#allocation7], %s323_s0, %s323_s0, %s324_s7  }
  0x23   :  { %315 = dma.done.wait [#allocation4], 64  }
  0x24   :  { %316 = vsyncadd [#allocation4], 4294967232 }
  0x25   :  { %317 = dma.done.wait [#allocation7], 1024  }
  0x26   :  { %318 = vsyncadd [#allocation7], 4294966272  ;;  %v325_v0 = vmov 0.0   ;;  %vm326_vm0 = vmmov 0   ;;  %v237_v1 = vld [vmem:[#allocation6] sm:$0xff]   ;;  %v238_v2 = vld [vmem:[#allocation6 + $0x8] sm:$0xff]  }
  0x27   :  { %210 = vmatprep.subr.bf16.mxu0 %v325_v0  ;;  %226 = vmatprep.mubr.msk.bf16.mxu0 %vm326_vm0, %v325_v0  ;;  %v239_v3 = vld [vmem:[#allocation6 + $0x10] sm:$0xff]   ;;  %v240_v4 = vld [vmem:[#allocation6 + $0x18] sm:$0xff]   ;;  %v241_v5 = vld [vmem:[#allocation6 + $0x20] sm:$0xff]   ;;  %s327_s11 = smov [#allocation8]  }
  0x28   :  { %211 = vmatpush3.bf16.msra.mxu0 %v237_v1  ;;  %v242_v6 = vld [vmem:[#allocation6 + $0x28] sm:$0xff]   ;;  %v243_v7 = vld [vmem:[#allocation6 + $0x30] sm:$0xff]   ;;  %v244_v8 = vld [vmem:[#allocation6 + $0x38] sm:$0xff]   ;;  %s182_s12 = sshll.u32 %s327_s11, 4  ;;  %s183_s12 = int_to_ptr.vmem [resolvable:$true] %s182_s12 }
  0x29   :  { %212 = vmatprep.subr.bf16.mxu0 %v325_v0  ;;  %v48_v9 = vld [vmem:[#allocation3] sm:$0xf]  ;;  %s293_s13 = scalar_lea.vmem %s183_s12, 64  ;;  %p298_p3 = scmp.lt.s32.totalorder %s183_s12, %s183_s12 }
  0x2a   :  { %v200_v10 = vld [vmem:[%s396_s2] ss:$0 sm:$0xff]  ;;  %p294_p2 = scmp.ne.s32.totalorder %s183_s12, %s293_s13  ;;  %p299_p4 = scmp.lt.s32.totalorder %s293_s13, %s293_s13 }
  0x2c   :  { %213 = vmatpush3.bf16.msra.mxu0 %v238_v2  ;;  %p300_p5 = por %p299_p4, %p298_p3 }
  0x2d   :  { %214 = vmatprep.subr.bf16.mxu0 %v325_v0 }
  0x2e   :  { %p301_p6 = pnand %p300_p5, %p294_p2 }
  0x30   :  { %215 = vmatpush3.bf16.msra.mxu0 %v239_v3 }
  0x31   :  { %216 = vmatprep.subr.bf16.mxu0 %v325_v0 }
  0x34   :  { %217 = vmatpush3.bf16.msra.mxu0 %v240_v4 }
  0x35   :  { %218 = vmatprep.subr.bf16.mxu0 %v325_v0 }
  0x38   :  { %219 = vmatpush3.bf16.msra.mxu0 %v241_v5 }
  0x39   :  { %220 = vmatprep.subr.bf16.mxu0 %v325_v0 }
  0x3c   :  { %221 = vmatpush3.bf16.msra.mxu0 %v242_v6 }
  0x3d   :  { %222 = vmatprep.subr.bf16.mxu0 %v325_v0 }
  0x40   :  { %223 = vmatpush3.bf16.msra.mxu0 %v243_v7 }
  0x41   :  { %224 = vmatprep.subr.bf16.mxu0 %v325_v0 }
  0x44   :  { %225 = vmatpush3.bf16.msra.mxu0 %v244_v8 }
  0x47   :  { %227 = vmatmul.mubr.bf16.vlgmr.msra.gmra.mrb[0].mxu0 %v48_v9 }
 0x11a   :  { %v147_v11 = vpop.f32.mrb[0].mxu0 }
 0x11b   :  { %v166_v12 = vadd.f32 %v200_v10, %v147_v11  ;;  %v228_v13 = vpop.f32.mrb[1].mxu0 }
 0x11c   :  { %v150_v14 = vpop.f32.mrb[2].mxu0 }
 0x11d   :  { %v167_v15 = vsub.f32 0.0, %v166_v12  ;;  %v229_v16 = vpop.f32.mrb[3].mxu0 }
 0x11f   :  { %v168_v17 = vmul.f32 1.442695, %v167_v15 }
 0x121   :  { %245 = vpow2.f32 %v168_v17 }
 0x12b   :  { %v246_v18 = vpop.eup %245 }
 0x12c   :  { %v170_v19 = vadd.f32 1.0, %v246_v18 }
 0x12e   :  { %247 = vrcp.f32 %v170_v19 }
 0x138   :  { %v248_v20 = vpop.eup %247 }
 0x139   :  { %v173_v21 = vmul.f32 %v248_v20, %v166_v12 }
 0x13b   :  { %v174_v22 = vpack.c.bf16 %v173_v21, %v173_v21 }
 0x13d   :  { %175 = vst [vmem:[#allocation8] sm:$0xf] %v174_v22 }
 0x13e   :  { %304 = shalt.err (!%p301_p6)
}
 0x13f   :  { %s305_s15 = scalar_lea.hbm %s397_s3, 64 }
 0x140   :  { %p306_p7 = scmp.ne.s32.totalorder %s397_s3, %s305_s15  ;;  %p309_p8 = scmp.lt.u32.totalorder %s305_s15, %s397_s3 }
 0x142   :  { %p311_p9 = pnand %p309_p8, %p306_p7 }
 0x144   :  { %314 = shalt.err (!%p311_p9)
}
 0x145   :  { %185 = dma.vmem_to_hbm [thread:$0]  %s183_s12, 64, %s397_s3, [#allocation5]  }
 0x146   :  { %319 = dma.done.wait [#allocation5], 64  }
 0x147   :  { %320 = vsyncadd [#allocation5], 4294967232 }
 0x148   :  { %189 = vsyncpa [#allocation4], 1 }
 0x149   :  { %190 = vsyncpa [#allocation7], 1 }
 0x14a   :  { %191 = vsyncpa [#allocation5], 1 }

</bundles_post_ra>
